<compile_context>
chip_gen: v7x
topology: tpu7x:2x2x1
jax: 0.10.0
libtpu: 0.0.40
codegen_flags: <defaults>
</compile_context>

<pallas_src>
import functools

import jax
import jax.numpy as jnp
from jax.experimental import pallas as pl
from jax.experimental.pallas import tpu as pltpu

BOARD_SIZE = (16, 16)                       # module's global BOARD_SIZE
HIDDEN = 256
FLAT = 3 * BOARD_SIZE[0] * BOARD_SIZE[1]    # 768


def _round_up(n, m):
    return (n + m - 1) // m * m


def _autoencoder_kernel(x_ref, w1_ref, b1_ref, w2_ref, b2_ref, out_ref):
    """Fused encoder+decoder for one batch tile.

    x_ref:  [TB, FLAT]      f32/bf16  (pipelined per grid step)
    w1_ref: [FLAT, HIDDEN]  bf16      (resident; encoder weight, transposed vs. PyTorch)
    b1_ref: [1, HIDDEN]     f32
    w2_ref: [HIDDEN, FLAT]  bf16      (resident; decoder weight, transposed vs. PyTorch)
    b2_ref: [1, FLAT]       f32
    out_ref:[TB, FLAT]      bf16/f32  (pipelined per grid step)
    """
    # bf16 matmul operands -> full-rate MXU; f32 accumulation + f32 elementwise
    # (bias/ReLU/sigmoid) keeps accuracy and avoids bf16 VPU work (none on v5e).
    x = x_ref[...].astype(jnp.bfloat16)
    z = jnp.dot(x, w1_ref[...], preferred_element_type=jnp.float32) + b1_ref[...]
    z = jnp.maximum(z, 0.0)                                   # ReLU
    y = jnp.dot(z.astype(jnp.bfloat16), w2_ref[...],
                preferred_element_type=jnp.float32) + b2_ref[...]
    out_ref[...] = jax.nn.sigmoid(y).astype(out_ref.dtype)    # Sigmoid (EUP slot)


def prepare_params(w1, b1, w2, b2):
    """One-time conversion from PyTorch nn.Linear layout to kernel layout.

    w1: [HIDDEN, FLAT], b1: [HIDDEN], w2: [FLAT, HIDDEN], b2: [FLAT]
    Returns (w1_t bf16 [FLAT,HIDDEN], b1 f32 [1,HIDDEN], w2_t bf16 [HIDDEN,FLAT],
    b2 f32 [1,FLAT]).  Do this once at parameter setup, not per forward call.
    NOTE: bf16 weights deviate from a bit-exact f32 PyTorch forward (documented
    tolerance ~2e-2); f32 accumulation + f32 bias/sigmoid keep it sound.
    """
    w1_t = jnp.asarray(w1, jnp.float32).T.astype(jnp.bfloat16)
    w2_t = jnp.asarray(w2, jnp.float32).T.astype(jnp.bfloat16)
    b1_2d = jnp.asarray(b1, jnp.float32).reshape(1, HIDDEN)
    b2_2d = jnp.asarray(b2, jnp.float32).reshape(1, FLAT)
    return (w1_t, b1_2d, w2_t, b2_2d)


@functools.partial(jax.jit, static_argnames=("batch_tile", "out_dtype"))
def one_layer_autoencoder_forward(x_nchw, params, *, batch_tile=256,
                                  out_dtype=jnp.bfloat16):
    """x_nchw: [B, 3, H, W] (f32 or bf16).  params: output of prepare_params.

    Returns [B, 3, H, W] in `out_dtype` (bf16 default to halve the HBM write
    stream; pass out_dtype=jnp.float32 for the PyTorch-exact dtype).
    """
    w1_t, b1_2d, w2_t, b2_2d = params
    B = x_nchw.shape[0]

    # nn.Flatten over (C,H,W) in NCHW order.  Keep producer dtype if it is
    # already f32/bf16 (no standalone cast pass over HBM).
    x_flat = x_nchw.reshape(B, FLAT)
    if x_flat.dtype != jnp.float32 and x_flat.dtype != jnp.bfloat16:
        x_flat = x_flat.astype(jnp.float32)

    # --- Batch tiling.  Memory-bound kernel: pick TB for pipeline depth, not
    # VMEM capacity.  Pad only to a multiple of 8 (sublane); a partial last
    # tile is handled by Pallas' clipped edge-block DMAs, so no pad-to-TB /
    # slice-back full-array copies.
    B8 = _round_up(B, 8)
    if B8 != B:                                   # only tiny / ragged batches
        x_flat = jnp.pad(x_flat, ((0, B8 - B), (0, 0)))

    bt = max(8, min(int(batch_tile), 1024))       # cap: buffers << 32 MiB everywhere
    bt = (bt // 8) * 8                            # (8,128) sublane constraint
    # Aim for ~8 grid steps at large B (DMA/compute overlap + both v7x cores),
    # but never below 128 rows per tile (per-step overhead) nor above B8.
    TB = min(bt, max(128, _round_up(pl.cdiv(B8, 8), 8)), B8)
    n_tiles = pl.cdiv(B8, TB)                     # last tile may be partial

    # Deeper buffering on the activation streams once there is real pipelining.
    if n_tiles >= 4:
        x_spec = pl.BlockSpec((TB, FLAT), lambda i: (i, 0),
                              pipeline_mode=pl.Buffered(3))
        o_spec = pl.BlockSpec((TB, FLAT), lambda i: (i, 0),
                              pipeline_mode=pl.Buffered(3))
    else:
        x_spec = pl.BlockSpec((TB, FLAT), lambda i: (i, 0))
        o_spec = pl.BlockSpec((TB, FLAT), lambda i: (i, 0))

    x_bytes = x_flat.dtype.itemsize
    out_bytes = jnp.dtype(out_dtype).itemsize
    cost = pl.CostEstimate(
        flops=4 * B8 * FLAT * HIDDEN,                         # two matmuls, 2*M*N*K each
        transcendentals=B8 * FLAT,                            # sigmoid exp
        bytes_accessed=(B8 * FLAT * (x_bytes + out_bytes)     # x read + out write
                        + 2 * FLAT * HIDDEN * 2               # both weights (bf16)
                        + (HIDDEN + FLAT) * 4),               # biases (f32)
    )

    out_flat = pl.pallas_call(
        _autoencoder_kernel,
        out_shape=jax.ShapeDtypeStruct((B8, FLAT), out_dtype),
        grid=(n_tiles,),
        in_specs=[
            x_spec,                                           # x tile (pipelined)
            pl.BlockSpec((FLAT, HIDDEN), lambda i: (0, 0)),   # w1^T (resident)
            pl.BlockSpec((1, HIDDEN), lambda i: (0, 0)),      # b1   (resident)
            pl.BlockSpec((HIDDEN, FLAT), lambda i: (0, 0)),   # w2^T (resident)
            pl.BlockSpec((1, FLAT), lambda i: (0, 0)),        # b2   (resident)
        ],
        out_specs=o_spec,
        compiler_params=pltpu.CompilerParams(
            dimension_semantics=("parallel",),                # megacore-shard batch
            vmem_limit_bytes=32 * 1024 * 1024,                # fits v5e/v6e/v7x budgets
        ),
        cost_estimate=cost,
    )(x_flat, w1_t, b1_2d, w2_t, b2_2d)

    if B8 != B:
        out_flat = out_flat[:B]
    # nn.Unflatten(1, (3, H, W))
    return out_flat.reshape(B, 3, BOARD_SIZE[0], BOARD_SIZE[1])


def init_params(key):
    """Deterministic synthetic params matching PyTorch nn.Linear default init
    (uniform +/- 1/sqrt(fan_in)), in PyTorch layout."""
    k1, k2, k3, k4 = jax.random.split(key, 4)
    bound1 = 1.0 / jnp.sqrt(FLAT)
    bound2 = 1.0 / jnp.sqrt(HIDDEN)
    w1 = jax.random.uniform(k1, (HIDDEN, FLAT), jnp.float32, -bound1, bound1)
    b1 = jax.random.uniform(k2, (HIDDEN,), jnp.float32, -bound1, bound1)
    w2 = jax.random.uniform(k3, (FLAT, HIDDEN), jnp.float32, -bound2, bound2)
    b2 = jax.random.uniform(k4, (FLAT,), jnp.float32, -bound2, bound2)
    return w1, b1, w2, b2


if __name__ == "__main__":
    key = jax.random.PRNGKey(0)
    kx, kp = jax.random.split(key)

    B = 2
    x = jax.random.uniform(kx, (B, 3, BOARD_SIZE[0], BOARD_SIZE[1]), jnp.float32)
    w1, b1, w2, b2 = init_params(kp)
    params = prepare_params(w1, b1, w2, b2)     # one-time transpose + bf16 cast

    out = one_layer_autoencoder_forward(x, params)
    out = jax.block_until_ready(out)

    # Pure-JAX f32 reference of the exact PyTorch forward.  Kernel uses bf16
    # matmul operands (f32 accumulation) and a bf16 output -> tolerance relaxed.
    x_flat = x.reshape(B, FLAT)
    z_ref = jnp.maximum(x_flat @ w1.T + b1, 0.0)
    y_ref = jax.nn.sigmoid(z_ref @ w2.T + b2).reshape(B, 3, *BOARD_SIZE)
    assert out.shape == (B, 3, BOARD_SIZE[0], BOARD_SIZE[1])
    out_f32 = out.astype(jnp.float32)
    max_err = float(jnp.max(jnp.abs(out_f32 - y_ref)))
    assert jnp.allclose(out_f32, y_ref, atol=2e-2, rtol=0.0), max_err

    print("KERNEL_OK")
</pallas_src>

<mosaic_0001>
module attributes {stable_mosaic.version = 11 : i64} {
  func.func @_autoencoder_kernel(%arg0: i32, %arg1: memref<8x768xf32, #tpu.memory_space<vmem>>, %arg2: memref<768x256xbf16, #tpu.memory_space<vmem>>, %arg3: memref<1x256xf32, #tpu.memory_space<vmem>>, %arg4: memref<256x768xbf16, #tpu.memory_space<vmem>>, %arg5: memref<1x768xf32, #tpu.memory_space<vmem>>, %arg6: memref<8x768xbf16, #tpu.memory_space<vmem>>) attributes {dimension_semantics = [#tpu.dimension_semantics<parallel>], iteration_bounds = array<i64: 1>, scalar_prefetch = 0 : i64, scratch_operands = 0 : i64, tpu.core_type = #tpu.core_type<tc>, window_params = [{transform_indices = @transform_0, window_bounds = array<i64: 8, 768>}, {pipeline_mode = #tpu.pipeline_mode<synchronous>, transform_indices = @transform_1, window_bounds = array<i64: 768, 256>}, {pipeline_mode = #tpu.pipeline_mode<synchronous>, transform_indices = @transform_2, window_bounds = array<i64: 1, 256>}, {pipeline_mode = #tpu.pipeline_mode<synchronous>, transform_indices = @transform_3, window_bounds = array<i64: 256, 768>}, {pipeline_mode = #tpu.pipeline_mode<synchronous>, transform_indices = @transform_4, window_bounds = array<i64: 1, 768>}, {transform_indices = @transform_5, window_bounds = array<i64: 8, 768>}]} {
    %c0 = arith.constant 0 : index
    %c0_0 = arith.constant 0 : index
    %0 = vector.load %arg1[%c0, %c0_0] : memref<8x768xf32, #tpu.memory_space<vmem>>, vector<8x768xf32>
    %1 = arith.truncf %0 : vector<8x768xf32> to vector<8x768xbf16>
    %c0_1 = arith.constant 0 : index
    %c0_2 = arith.constant 0 : index
    %2 = vector.load %arg2[%c0_1, %c0_2] : memref<768x256xbf16, #tpu.memory_space<vmem>>, vector<768x256xbf16>
    %cst = arith.constant dense<0.000000e+00> : vector<8x256xf32>
    %3 = tpu.matmul %1, %2, %cst {dimension_numbers = #tpu.dot_dimension_numbers<[1], [0], [0], [1], [0, 0, 1, 1], [], []>} : vector<8x768xbf16>, vector<768x256xbf16>, vector<8x256xf32> -> vector<8x256xf32>
    %c0_3 = arith.constant 0 : index
    %c0_4 = arith.constant 0 : index
    %4 = vector.load %arg3[%c0_3, %c0_4] : memref<1x256xf32, #tpu.memory_space<vmem>>, vector<1x256xf32>
    %5 = vector.broadcast %4 : vector<1x256xf32> to vector<8x256xf32>
    %6 = arith.addf %3, %5 : vector<8x256xf32>
    %cst_5 = arith.constant 0.000000e+00 : f32
    %7 = vector.broadcast %cst_5 : f32 to vector<8x256xf32>
    %8 = arith.maximumf %6, %7 : vector<8x256xf32>
    %9 = arith.truncf %8 : vector<8x256xf32> to vector<8x256xbf16>
    %c0_6 = arith.constant 0 : index
    %c0_7 = arith.constant 0 : index
    %10 = vector.load %arg4[%c0_6, %c0_7] : memref<256x768xbf16, #tpu.memory_space<vmem>>, vector<256x768xbf16>
    %cst_8 = arith.constant dense<0.000000e+00> : vector<8x768xf32>
    %11 = tpu.matmul %9, %10, %cst_8 {dimension_numbers = #tpu.dot_dimension_numbers<[1], [0], [0], [1], [0, 0, 1, 1], [], []>} : vector<8x256xbf16>, vector<256x768xbf16>, vector<8x768xf32> -> vector<8x768xf32>
    %c0_9 = arith.constant 0 : index
    %c0_10 = arith.constant 0 : index
    %12 = vector.load %arg5[%c0_9, %c0_10] : memref<1x768xf32, #tpu.memory_space<vmem>>, vector<1x768xf32>
    %13 = vector.broadcast %12 : vector<1x768xf32> to vector<8x768xf32>
    %14 = arith.addf %11, %13 : vector<8x768xf32>
    %15 = arith.negf %14 : vector<8x768xf32>
    %16 = math.exp %15 : vector<8x768xf32>
    %cst_11 = arith.constant 1.000000e+00 : f32
    %17 = vector.broadcast %cst_11 : f32 to vector<8x768xf32>
    %18 = arith.addf %17, %16 : vector<8x768xf32>
    %19 = arith.divf %17, %18 : vector<8x768xf32>
    %20 = arith.truncf %19 : vector<8x768xf32> to vector<8x768xbf16>
    %c0_12 = arith.constant 0 : index
    %c0_13 = arith.constant 0 : index
    %21 = vector.load %arg6[%c0_12, %c0_13] : memref<8x768xbf16, #tpu.memory_space<vmem>>, vector<8x768xbf16>
    tpu.vector_store %arg6[%c0_12, %c0_13], %20 {strides = array<i32>} : memref<8x768xbf16, #tpu.memory_space<vmem>>, vector<8x768xbf16>,
    return
  }
  func.func @transform_0(%arg0: i32) -> (i32, i32) {
    %c0_i32 = arith.constant 0 : i32
    %c0_i32_0 = arith.constant 0 : i32
    return %arg0, %c0_i32 : i32, i32
  }
  func.func @transform_1(%arg0: i32) -> (i32, i32) {
    %c0_i32 = arith.constant 0 : i32
    %c0_i32_0 = arith.constant 0 : i32
    %c0_i32_1 = arith.constant 0 : i32
    return %c0_i32, %c0_i32_0 : i32, i32
  }
  func.func @transform_2(%arg0: i32) -> (i32, i32) {
    %c0_i32 = arith.constant 0 : i32
    %c0_i32_0 = arith.constant 0 : i32
    %c0_i32_1 = arith.constant 0 : i32
    return %c0_i32, %c0_i32_0 : i32, i32
  }
  func.func @transform_3(%arg0: i32) -> (i32, i32) {
    %c0_i32 = arith.constant 0 : i32
    %c0_i32_0 = arith.constant 0 : i32
    %c0_i32_1 = arith.constant 0 : i32
    return %c0_i32, %c0_i32_0 : i32, i32
  }
  func.func @transform_4(%arg0: i32) -> (i32, i32) {
    %c0_i32 = arith.constant 0 : i32
    %c0_i32_0 = arith.constant 0 : i32
    %c0_i32_1 = arith.constant 0 : i32
    return %c0_i32, %c0_i32_0 : i32, i32
  }
  func.func @transform_5(%arg0: i32) -> (i32, i32) {
    %c0_i32 = arith.constant 0 : i32
    %c0_i32_0 = arith.constant 0 : i32
    return %arg0, %c0_i32 : i32, i32
  }
}

</mosaic_0001>

<bundles_post_ra>
// kernel: one_layer_autoencoder_forward.1
= control target key start
LH: loop header
LB: loop body
LE: loop exit
PB: predicated region body
PF: predicated region fallthrough
CT: control target
= control target key end

     0   :  { %10 = vsyncpa [#allocation3], 0  ;;  %s2274_s0 = inlined_call_operand.vmem [shape: f32[8,768], index: 0, kind: input, shape index: {}]   ;;  %s2275_s1 = inlined_call_operand.hbm [shape: bf16[768,256], index: 1, kind: input, shape index: {}]   ;;  %s2276_s2 = inlined_call_operand.vmem [shape: f32[1,256], index: 2, kind: input, shape index: {}]   ;;  %s2277_s3 = inlined_call_operand.hbm [shape: bf16[256,768], index: 3, kind: input, shape index: {}]   ;;  %s2278_s4 = inlined_call_operand.vmem [shape: f32[1,768], index: 4, kind: input, shape index: {}]   ;;  %s2279_s5 = inlined_call_operand.vmem [shape: bf16[8,768], index: 5, kind: output, shape index: {}]  }
   0x1   :  { %11 = vsyncpa [#allocation5], 0  ;;  %s2155_s18 = smov [#allocation2]   ;;  %s2107_s22 = scalar_lea.hbm %s2275_s1, 12288 }
   0x2   :  { %s19_s19 = sshll.u32 %s2155_s18, 4  ;;  %p2108_p0 = scmp.ne.s32.totalorder %s2275_s1, %s2107_s22  ;;  %s20_s19 = int_to_ptr.vmem [resolvable:$true] %s19_s19 }
   0x3   :  { %p2111_p1 = scmp.lt.u32.totalorder %s2107_s22, %s2275_s1 }
   0x5   :  { %p2113_p2 = pnand %p2111_p1, %p2108_p0 }
   0x7   :  { %2116 = shalt.err (!%p2113_p2)
}
   0x8   :  { %s2117_s27 = scalar_lea.vmem %s20_s19, 12288  ;;  %p2122_p4 = scmp.lt.s32.totalorder %s20_s19, %s20_s19 }
   0x9   :  { %p2118_p3 = scmp.ne.s32.totalorder %s20_s19, %s2117_s27  ;;  %p2123_p5 = scmp.lt.s32.totalorder %s2117_s27, %s2117_s27 }
   0xb   :  { %p2124_p6 = por %p2123_p5, %p2122_p4 }
   0xd   :  { %p2125_p7 = pnand %p2124_p6, %p2118_p3 }
   0xf   :  { %2128 = shalt.err (!%p2125_p7)
}
  0x10   :  { %s2156_s28 = smov 128   ;;  %s2157_s29 = smov 8  }
  0x11   :  { %25 = dma.hbm_to_vmem [thread:$0]  %s2275_s1, 12288, %s20_s19, [#allocation3], %s2156_s28, %s2156_s28, %s2157_s29  }
  0x12   :  { %s2158_s7 = smov [#allocation4]   ;;  %s2129_s11 = scalar_lea.hbm %s2277_s3, 12288 }
  0x13   :  { %s33_s8 = sshll.u32 %s2158_s7, 4  ;;  %p2130_p8 = scmp.ne.s32.totalorder %s2277_s3, %s2129_s11  ;;  %s34_s8 = int_to_ptr.vmem [resolvable:$true] %s33_s8 }
  0x14   :  { %p2133_p9 = scmp.lt.u32.totalorder %s2129_s11, %s2277_s3 }
  0x16   :  { %p2135_p10 = pnand %p2133_p9, %p2130_p8 }
  0x18   :  { %2138 = shalt.err (!%p2135_p10)
}
  0x19   :  { %s2139_s16 = scalar_lea.vmem %s34_s8, 12288  ;;  %p2144_p12 = scmp.lt.s32.totalorder %s34_s8, %s34_s8 }
  0x1a   :  { %p2140_p11 = scmp.ne.s32.totalorder %s34_s8, %s2139_s16  ;;  %p2145_p13 = scmp.lt.s32.totalorder %s2139_s16, %s2139_s16 }
  0x1c   :  { %p2146_p0 = por %p2145_p13, %p2144_p12 }
  0x1e   :  { %p2147_p1 = pnand %p2146_p0, %p2140_p11 }
  0x20   :  { %2150 = shalt.err (!%p2147_p1)
}
  0x21   :  { %s2159_s1 = smov 384   ;;  %s2160_s17 = smov 24  }
  0x22   :  { %39 = dma.hbm_to_vmem [thread:$0]  %s2277_s3, 12288, %s34_s8, [#allocation5], %s2159_s1, %s2159_s1, %s2160_s17  }
  0x23   :  { %2151 = dma.done.wait [#allocation3], 12288  }
  0x24   :  { %2152 = vsyncadd [#allocation3], 4294955008 }
  0x25   :  { %2153 = dma.done.wait [#allocation5], 12288  }
  0x26   :  { %2154 = vsyncadd [#allocation5], 4294955008  ;;  %v1795_v0 = vld [vmem:[#allocation2 + $0x4] ss:$8 sps:$4 sm:$0xff]   ;;  %v1797_v1 = vld [vmem:[#allocation2] ss:$8 sps:$4 sm:$0xff]  }
  0x27   :  { %648 = vmatprep.subr.bf16.mxu0 %v1795_v0  ;;  %v1798_v2 = vld [vmem:[#allocation2 + $0x14] ss:$8 sps:$4 sm:$0xff]   ;;  %v1800_v3 = vld [vmem:[#allocation2 + $0x10] ss:$8 sps:$4 sm:$0xff]   ;;  %v1801_v4 = vld [vmem:[#allocation2 + $0x24] ss:$8 sps:$4 sm:$0xff]  }
  0x28   :  { %649 = vmatpush1.bf16.msra.mxu0 %v1797_v1  ;;  %v1803_v5 = vld [vmem:[#allocation2 + $0x20] ss:$8 sps:$4 sm:$0xff]   ;;  %v1804_v6 = vld [vmem:[#allocation2 + $0x34] ss:$8 sps:$4 sm:$0xff]   ;;  %v1806_v7 = vld [vmem:[#allocation2 + $0x30] ss:$8 sps:$4 sm:$0xff]  }
  0x29   :  { %650 = vmatprep.subr.bf16.mxu0 %v1798_v2  ;;  %v1807_v8 = vld [vmem:[#allocation2 + $0x44] ss:$8 sps:$4 sm:$0xff]   ;;  %v1809_v9 = vld [vmem:[#allocation2 + $0x40] ss:$8 sps:$4 sm:$0xff]   ;;  %v1810_v10 = vld [vmem:[#allocation2 + $0x54] ss:$8 sps:$4 sm:$0xff]  }
  0x2a   :  { %v1812_v11 = vld [vmem:[#allocation2 + $0x50] ss:$8 sps:$4 sm:$0xff]   ;;  %v1813_v12 = vld [vmem:[#allocation2 + $0x64] ss:$8 sps:$4 sm:$0xff]   ;;  %v1815_v15 = vld [vmem:[#allocation2 + $0x60] ss:$8 sps:$4 sm:$0xff]  }
  0x2b   :  { %v49_v13 = vld [vmem:[%s2274_s0 + $0x8] sm:$0xff]  ;;  %v1816_v16 = vld [vmem:[#allocation2 + $0x74] ss:$8 sps:$4 sm:$0xff]   ;;  %v1818_v17 = vld [vmem:[#allocation2 + $0x70] ss:$8 sps:$4 sm:$0xff]  }
  0x2c   :  { %651 = vmatpush1.bf16.msra.mxu0 %v1800_v3  ;;  %v55_v14 = vpack.c.bf16 %v49_v13, %v49_v13  ;;  %v1819_v18 = vld [vmem:[#allocation2 + $0x84] ss:$8 sps:$4 sm:$0xff]   ;;  %v1821_v19 = vld [vmem:[#allocation2 + $0x80] ss:$8 sps:$4 sm:$0xff]   ;;  %v1822_v20 = vld [vmem:[#allocation2 + $0x94] ss:$8 sps:$4 sm:$0xff]  }
  0x2d   :  { %652 = vmatprep.subr.bf16.mxu0 %v1801_v4  ;;  %v1824_v21 = vld [vmem:[#allocation2 + $0x90] ss:$8 sps:$4 sm:$0xff]   ;;  %v1825_v22 = vld [vmem:[#allocation2 + $0xa4] ss:$8 sps:$4 sm:$0xff]   ;;  %v1827_v23 = vld [vmem:[#allocation2 + $0xa0] ss:$8 sps:$4 sm:$0xff]  }
  0x2e   :  { %680 = vmatprep.mubr.bf16.mxu0 %v55_v14  ;;  %v1828_v24 = vld [vmem:[#allocation2 + $0xb4] ss:$8 sps:$4 sm:$0xff]   ;;  %v1830_v25 = vld [vmem:[#allocation2 + $0xb0] ss:$8 sps:$4 sm:$0xff]   ;;  %v1831_v26 = vld [vmem:[#allocation2 + $0xc4] ss:$8 sps:$4 sm:$0xff]  }
  0x2f   :  { %v1833_v27 = vld [vmem:[#allocation2 + $0xc0] ss:$8 sps:$4 sm:$0xff]   ;;  %v1834_v28 = vld [vmem:[#allocation2 + $0xd4] ss:$8 sps:$4 sm:$0xff]   ;;  %v1836_v29 = vld [vmem:[#allocation2 + $0xd0] ss:$8 sps:$4 sm:$0xff]  }
  0x30   :  { %653 = vmatpush1.bf16.msra.mxu0 %v1803_v5  ;;  %v1837_v30 = vld [vmem:[#allocation2 + $0xe4] ss:$8 sps:$4 sm:$0xff]   ;;  %v1839_v31 = vld [vmem:[#allocation2 + $0xe0] ss:$8 sps:$4 sm:$0xff]   ;;  %v1840_v32 = vld [vmem:[#allocation2 + $0xf4] ss:$8 sps:$4 sm:$0xff]  }
  0x31   :  { %654 = vmatprep.subr.bf16.mxu0 %v1804_v6  ;;  %v1842_v33 = vld [vmem:[#allocation2 + $0xf0] ss:$8 sps:$4 sm:$0xff]   ;;  %v1845_v34 = vld [vmem:[#allocation2 + $0x104] ss:$8 sps:$4 sm:$0xff]   ;;  %v1843_v38 = vld [vmem:[#allocation2 + $0x100] ss:$8 sps:$4 sm:$0xff]  }
  0x32   :  { %v48_v35 = vld [vmem:[%s2274_s0] sm:$0xff]  ;;  %v51_v36 = vld [vmem:[%s2274_s0 + $0x18] sm:$0xff]  ;;  %v1942_v45 = vld [vmem:[#allocation4 + $0x34] ss:$24 sps:$4 sm:$0xff]  }
  0x33   :  { %v54_v37 = vpack.c.bf16 %v48_v35, %v48_v35  ;;  %v57_v39 = vpack.c.bf16 %v51_v36, %v51_v36  ;;  %v1848_v40 = vld [vmem:[#allocation2 + $0x114] ss:$8 sps:$4 sm:$0xff]   ;;  %v1846_v41 = vld [vmem:[#allocation2 + $0x110] ss:$8 sps:$4 sm:$0xff]   ;;  %v1851_v44 = vld [vmem:[#allocation2 + $0x124] ss:$8 sps:$4 sm:$0xff]  }
  0x34   :  { %655 = vmatpush1.bf16.msra.mxu0 %v1806_v7  ;;  %v1939_v42 = vld [vmem:[#allocation4 + $0x4] ss:$24 sps:$4 sm:$0xff]   ;;  %v1941_v43 = vld [vmem:[#allocation4] ss:$24 sps:$4 sm:$0xff]   ;;  %v1944_v46 = vld [vmem:[#allocation4 + $0x30] ss:$24 sps:$4 sm:$0xff]  }
  0x35   :  { %656 = vmatprep.subr.bf16.mxu0 %v1807_v8  ;;  %1383 = vmatprep.subr.bf16.mxu1 %v1939_v42  ;;  %v1945_v47 = vld [vmem:[#allocation4 + $0x64] ss:$24 sps:$4 sm:$0xff]   ;;  %v1849_v48 = vld [vmem:[#allocation2 + $0x120] ss:$8 sps:$4 sm:$0xff]   ;;  %v1948_v51 = vld [vmem:[#allocation4 + $0x94] ss:$24 sps:$4 sm:$0xff]  }
  0x36   :  { %1384 = vmatpush1.bf16.msra.mxu1 %v1941_v43  ;;  %v1854_v49 = vld [vmem:[#allocation2 + $0x134] ss:$8 sps:$4 sm:$0xff]   ;;  %v1947_v50 = vld [vmem:[#allocation4 + $0x60] ss:$24 sps:$4 sm:$0xff]   ;;  %v1857_v53 = vld [vmem:[#allocation2 + $0x144] ss:$8 sps:$4 sm:$0xff]  }
  0x37   :  { %1385 = vmatprep.subr.bf16.mxu1 %v1942_v45  ;;  %v1852_v52 = vld [vmem:[#allocation2 + $0x130] ss:$8 sps:$4 sm:$0xff]   ;;  %v1951_v55 = vld [vmem:[#allocation4 + $0xc4] ss:$24 sps:$4 sm:$0xff]   ;;  %v1855_v56 = vld [vmem:[#allocation2 + $0x140] ss:$8 sps:$4 sm:$0xff]  }
  0x38   :  { %657 = vmatpush1.bf16.msra.mxu0 %v1809_v9  ;;  %v1950_v54 = vld [vmem:[#allocation4 + $0x90] ss:$24 sps:$4 sm:$0xff]   ;;  %v1860_v57 = vld [vmem:[#allocation2 + $0x154] ss:$8 sps:$4 sm:$0xff]   ;;  %v1953_v58 = vld [vmem:[#allocation4 + $0xc0] ss:$24 sps:$4 sm:$0xff]  }
  0x39   :  { %658 = vmatprep.subr.bf16.mxu0 %v1810_v10  ;;  %v1954_v59 = vld [vmem:[#allocation4 + $0xf4] ss:$24 sps:$4 sm:$0xff]   ;;  %v1858_v60 = vld [vmem:[#allocation2 + $0x150] ss:$8 sps:$4 sm:$0xff]   ;;  %v1957_v63 = vld [vmem:[#allocation4 + $0x124] ss:$24 sps:$4 sm:$0xff]  }
  0x3a   :  { %1386 = vmatpush1.bf16.msra.mxu1 %v1944_v46  ;;  %v1863_v61 = vld [vmem:[#allocation2 + $0x164] ss:$8 sps:$4 sm:$0xff]   ;;  %v1956_v62 = vld [vmem:[#allocation4 + $0xf0] ss:$24 sps:$4 sm:$0xff]   ;;  %v1866_v1 = vld [vmem:[#allocation2 + $0x174] ss:$8 sps:$4 sm:$0xff]  }
  0x3b   :  { %1387 = vmatprep.subr.bf16.mxu1 %v1945_v47  ;;  %v1861_v0 = vld [vmem:[#allocation2 + $0x160] ss:$8 sps:$4 sm:$0xff]   ;;  %v1960_v3 = vld [vmem:[#allocation4 + $0x154] ss:$24 sps:$4 sm:$0xff]   ;;  %v1864_v4 = vld [vmem:[#allocation2 + $0x170] ss:$8 sps:$4 sm:$0xff]  }
  0x3c   :  { %659 = vmatpush1.bf16.msra.mxu0 %v1812_v11  ;;  %v1959_v2 = vld [vmem:[#allocation4 + $0x120] ss:$24 sps:$4 sm:$0xff]   ;;  %v1869_v5 = vld [vmem:[#allocation2 + $0x184] ss:$8 sps:$4 sm:$0xff]   ;;  %v1962_v6 = vld [vmem:[#allocation4 + $0x150] ss:$24 sps:$4 sm:$0xff]  }
  0x3d   :  { %660 = vmatprep.subr.bf16.mxu0 %v1813_v12  ;;  %v1963_v7 = vld [vmem:[#allocation4 + $0x184] ss:$24 sps:$4 sm:$0xff]   ;;  %v1867_v8 = vld [vmem:[#allocation2 + $0x180] ss:$8 sps:$4 sm:$0xff]   ;;  %v1966_v11 = vld [vmem:[#allocation4 + $0x1b4] ss:$24 sps:$4 sm:$0xff]  }
  0x3e   :  { %1388 = vmatpush1.bf16.msra.mxu1 %v1947_v50  ;;  %v1872_v9 = vld [vmem:[#allocation2 + $0x194] ss:$8 sps:$4 sm:$0xff]   ;;  %v1965_v10 = vld [vmem:[#allocation4 + $0x180] ss:$24 sps:$4 sm:$0xff]   ;;  %v1875_v13 = vld [vmem:[#allocation2 + $0x1a4] ss:$8 sps:$4 sm:$0xff]  }
  0x3f   :  { %1389 = vmatprep.subr.bf16.mxu1 %v1948_v51  ;;  %v1870_v12 = vld [vmem:[#allocation2 + $0x190] ss:$8 sps:$4 sm:$0xff]   ;;  %v1893_v35 = vld [vmem:[#allocation2 + $0x204] ss:$8 sps:$4 sm:$0xff]   ;;  %v1897_v43 = vld [vmem:[#allocation2 + $0x220] ss:$8 sps:$4 sm:$0xff]  }
  0x40   :  { %661 = vmatpush1.bf16.msra.mxu0 %v1815_v15  ;;  %v1968_v14 = vld [vmem:[#allocation4 + $0x1b0] ss:$24 sps:$4 sm:$0xff]   ;;  %v1969_v15 = vld [vmem:[#allocation4 + $0x1e4] ss:$24 sps:$4 sm:$0xff]  }
  0x41   :  { %662 = vmatprep.subr.bf16.mxu0 %v1816_v16  ;;  %v1873_v16 = vld [vmem:[#allocation2 + $0x1a0] ss:$8 sps:$4 sm:$0xff]   ;;  %v1899_v42 = vld [vmem:[#allocation2 + $0x224] ss:$8 sps:$4 sm:$0xff]   ;;  %v1900_v45 = vld [vmem:[#allocation2 + $0x230] ss:$8 sps:$4 sm:$0xff]  }
  0x42   :  { %1390 = vmatpush1.bf16.msra.mxu1 %v1950_v54  ;;  %v53_v36 = vld [vmem:[%s2274_s0 + $0x28] sm:$0xff] }
  0x43   :  { %1391 = vmatprep.subr.bf16.mxu1 %v1951_v55  ;;  %v1905_v46 = vld [vmem:[#allocation2 + $0x244] ss:$8 sps:$4 sm:$0xff]   ;;  %v1903_v47 = vld [vmem:[#allocation2 + $0x240] ss:$8 sps:$4 sm:$0xff]  }
  0x44   :  { %663 = vmatpush1.bf16.msra.mxu0 %v1818_v17  ;;  %v1878_v17 = vld [vmem:[#allocation2 + $0x1b4] ss:$8 sps:$4 sm:$0xff]   ;;  %v1911_v50 = vld [vmem:[#allocation2 + $0x264] ss:$8 sps:$4 sm:$0xff]   ;;  %v1909_v51 = vld [vmem:[#allocation2 + $0x260] ss:$8 sps:$4 sm:$0xff]  }
  0x45   :  { %664 = vmatprep.subr.bf16.mxu0 %v1819_v18  ;;  %v1971_v18 = vld [vmem:[#allocation4 + $0x1e0] ss:$24 sps:$4 sm:$0xff]   ;;  %v1917_v54 = vld [vmem:[#allocation2 + $0x284] ss:$8 sps:$4 sm:$0xff]  }
  0x46   :  { %1392 = vmatpush1.bf16.msra.mxu1 %v1953_v58  ;;  %v1915_v55 = vld [vmem:[#allocation2 + $0x280] ss:$8 sps:$4 sm:$0xff]   ;;  %v1923_v58 = vld [vmem:[#allocation2 + $0x2a4] ss:$8 sps:$4 sm:$0xff]  }
  0x47   :  { %1393 = vmatprep.subr.bf16.mxu1 %v1954_v59  ;;  %v1921_v59 = vld [vmem:[#allocation2 + $0x2a0] ss:$8 sps:$4 sm:$0xff]  }
  0x48   :  { %665 = vmatpush1.bf16.msra.mxu0 %v1821_v19  ;;  %v1972_v19 = vld [vmem:[#allocation4 + $0x214] ss:$24 sps:$4 sm:$0xff]  }
  0x49   :  { %666 = vmatprep.subr.bf16.mxu0 %v1822_v20  ;;  %v1876_v20 = vld [vmem:[#allocation2 + $0x1b0] ss:$8 sps:$4 sm:$0xff]  }
  0x4a   :  { %1394 = vmatpush1.bf16.msra.mxu1 %v1956_v62  ;;  %v1929_v62 = vld [vmem:[#allocation2 + $0x2c4] ss:$8 sps:$4 sm:$0xff]  }
  0x4b   :  { %1395 = vmatprep.subr.bf16.mxu1 %v1957_v63  ;;  %v1927_v63 = vld [vmem:[#allocation2 + $0x2c0] ss:$8 sps:$4 sm:$0xff]  }
  0x4c   :  { %667 = vmatpush1.bf16.msra.mxu0 %v1824_v21  ;;  %v1881_v21 = vld [vmem:[#allocation2 + $0x1c4] ss:$8 sps:$4 sm:$0xff]  }
  0x4d   :  { %668 = vmatprep.subr.bf16.mxu0 %v1825_v22  ;;  %v1974_v22 = vld [vmem:[#allocation4 + $0x210] ss:$24 sps:$4 sm:$0xff]  }
  0x4e   :  { %1396 = vmatpush1.bf16.msra.mxu1 %v1959_v2  ;;  %v1935_v2 = vld [vmem:[#allocation2 + $0x2e4] ss:$8 sps:$4 sm:$0xff]  }
  0x4f   :  { %1397 = vmatprep.subr.bf16.mxu1 %v1960_v3  ;;  %v1933_v3 = vld [vmem:[#allocation2 + $0x2e0] ss:$8 sps:$4 sm:$0xff]  }
  0x50   :  { %669 = vmatpush1.bf16.msra.mxu0 %v1827_v23  ;;  %v1975_v23 = vld [vmem:[#allocation4 + $0x244] ss:$24 sps:$4 sm:$0xff]  }
  0x51   :  { %670 = vmatprep.subr.bf16.mxu0 %v1828_v24  ;;  %v1879_v24 = vld [vmem:[#allocation2 + $0x1c0] ss:$8 sps:$4 sm:$0xff]  }
  0x52   :  { %1398 = vmatpush1.bf16.msra.mxu1 %v1962_v6  ;;  %v52_v6 = vld [vmem:[%s2274_s0 + $0x20] sm:$0xff] }
  0x53   :  { %1399 = vmatprep.subr.bf16.mxu1 %v1963_v7  ;;  %v58_v7 = vpack.c.bf16 %v52_v6, %v52_v6  ;;  %v2047_v6 = vld [vmem:[#allocation4 + $0xd0] ss:$24 sps:$4 sm:$0xff]  }
  0x54   :  { %671 = vmatpush1.bf16.msra.mxu0 %v1830_v25  ;;  %v1884_v25 = vld [vmem:[#allocation2 + $0x1d4] ss:$8 sps:$4 sm:$0xff]  }
  0x55   :  { %672 = vmatprep.subr.bf16.mxu0 %v1831_v26  ;;  %v1977_v26 = vld [vmem:[#allocation4 + $0x240] ss:$24 sps:$4 sm:$0xff]  }
  0x56   :  { %1400 = vmatpush1.bf16.msra.mxu1 %v1965_v10  ;;  %v1984_v10 = vld [vmem:[#allocation4 + $0x2d4] ss:$24 sps:$4 sm:$0xff]  }
  0x57   :  { %1401 = vmatprep.subr.bf16.mxu1 %v1966_v11  ;;  %v1986_v11 = vld [vmem:[#allocation4 + $0x2d0] ss:$24 sps:$4 sm:$0xff]  }
  0x58   :  { %673 = vmatpush1.bf16.msra.mxu0 %v1833_v27  ;;  %v1978_v27 = vld [vmem:[#allocation4 + $0x274] ss:$24 sps:$4 sm:$0xff]  }
  0x59   :  { %674 = vmatprep.subr.bf16.mxu0 %v1834_v28  ;;  %v1882_v28 = vld [vmem:[#allocation2 + $0x1d0] ss:$8 sps:$4 sm:$0xff]  }
  0x5a   :  { %1402 = vmatpush1.bf16.msra.mxu1 %v1968_v14 }
  0x5b   :  { %1403 = vmatprep.subr.bf16.mxu1 %v1969_v15 }
  0x5c   :  { %675 = vmatpush1.bf16.msra.mxu0 %v1836_v29  ;;  %v1887_v29 = vld [vmem:[#allocation2 + $0x1e4] ss:$8 sps:$4 sm:$0xff]  }
  0x5d   :  { %676 = vmatprep.subr.bf16.mxu0 %v1837_v30  ;;  %v1980_v30 = vld [vmem:[#allocation4 + $0x270] ss:$24 sps:$4 sm:$0xff]  }
  0x5e   :  { %1404 = vmatpush1.bf16.msra.mxu1 %v1971_v18 }
  0x5f   :  { %1405 = vmatprep.subr.bf16.mxu1 %v1972_v19 }
  0x60   :  { %677 = vmatpush1.bf16.msra.mxu0 %v1839_v31  ;;  %v1885_v31 = vld [vmem:[#allocation2 + $0x1e0] ss:$8 sps:$4 sm:$0xff]  }
  0x61   :  { %678 = vmatprep.subr.bf16.mxu0 %v1840_v32  ;;  %v1890_v32 = vld [vmem:[#allocation2 + $0x1f4] ss:$8 sps:$4 sm:$0xff]  }
  0x62   :  { %1406 = vmatpush1.bf16.msra.mxu1 %v1974_v22 }
  0x63   :  { %1407 = vmatprep.subr.bf16.mxu1 %v1975_v23 }
  0x64   :  { %679 = vmatpush1.bf16.msra.mxu0 %v1842_v33  ;;  %v1888_v33 = vld [vmem:[#allocation2 + $0x1f0] ss:$8 sps:$4 sm:$0xff]  }
  0x65   :  { %689 = vmatprep.subr.bf16.mxu0 %v1845_v34  ;;  %v50_v34 = vld [vmem:[%s2274_s0 + $0x10] sm:$0xff] }
  0x66   :  { %1408 = vmatpush1.bf16.msra.mxu1 %v1977_v26 }
  0x67   :  { %681 = vmatmul.mubr.bf16.vlgmr.msra.gmra.mrb[0].mxu0 %v54_v37  ;;  %1409 = vmatprep.subr.bf16.mxu1 %v1978_v27  ;;  %v56_v37 = vpack.c.bf16 %v50_v34, %v50_v34  ;;  %v1993_v34 = vld [vmem:[#allocation4 + $0x68] ss:$24 sps:$4 sm:$0xff]  }
  0x68   :  { %690 = vmatpush1.bf16.msra.mxu0 %v1843_v38  ;;  %721 = vmatprep.mubr.bf16.mxu0 %v57_v39  ;;  %v1891_v38 = vld [vmem:[#allocation2 + $0x200] ss:$8 sps:$4 sm:$0xff]   ;;  %v59_v39 = vpack.c.bf16 %v53_v36, %v53_v36  ;;  %v1996_v36 = vld [vmem:[#allocation4 + $0x98] ss:$24 sps:$4 sm:$0xff]  }
  0x69   :  { %691 = vmatprep.subr.bf16.mxu0 %v1848_v40  ;;  %v1896_v40 = vld [vmem:[#allocation2 + $0x214] ss:$8 sps:$4 sm:$0xff]  }
  0x6a   :  { %1410 = vmatpush1.bf16.msra.mxu1 %v1980_v30 }
  0x6c   :  { %692 = vmatpush1.bf16.msra.mxu0 %v1846_v41  ;;  %v1894_v41 = vld [vmem:[#allocation2 + $0x210] ss:$8 sps:$4 sm:$0xff]  }
  0x6d   :  { %693 = vmatprep.subr.bf16.mxu0 %v1851_v44  ;;  %v1902_v44 = vld [vmem:[#allocation2 + $0x234] ss:$8 sps:$4 sm:$0xff]  }
  0x70   :  { %694 = vmatpush1.bf16.msra.mxu0 %v1849_v48  ;;  %v1908_v48 = vld [vmem:[#allocation2 + $0x254] ss:$8 sps:$4 sm:$0xff]  }
  0x71   :  { %695 = vmatprep.subr.bf16.mxu0 %v1854_v49  ;;  %v1906_v49 = vld [vmem:[#allocation2 + $0x250] ss:$8 sps:$4 sm:$0xff]  }
  0x74   :  { %696 = vmatpush1.bf16.msra.mxu0 %v1852_v52  ;;  %v1914_v52 = vld [vmem:[#allocation2 + $0x274] ss:$8 sps:$4 sm:$0xff]  }
  0x75   :  { %697 = vmatprep.subr.bf16.mxu0 %v1857_v53  ;;  %v1912_v53 = vld [vmem:[#allocation2 + $0x270] ss:$8 sps:$4 sm:$0xff]  }
  0x78   :  { %698 = vmatpush1.bf16.msra.mxu0 %v1855_v56  ;;  %v1920_v56 = vld [vmem:[#allocation2 + $0x294] ss:$8 sps:$4 sm:$0xff]  }
  0x79   :  { %699 = vmatprep.subr.bf16.mxu0 %v1860_v57  ;;  %v1918_v57 = vld [vmem:[#allocation2 + $0x290] ss:$8 sps:$4 sm:$0xff]  }
  0x7c   :  { %700 = vmatpush1.bf16.msra.mxu0 %v1858_v60  ;;  %v1926_v60 = vld [vmem:[#allocation2 + $0x2b4] ss:$8 sps:$4 sm:$0xff]  }
  0x7d   :  { %701 = vmatprep.subr.bf16.mxu0 %v1863_v61  ;;  %v1924_v61 = vld [vmem:[#allocation2 + $0x2b0] ss:$8 sps:$4 sm:$0xff]  }
  0x80   :  { %702 = vmatpush1.bf16.msra.mxu0 %v1861_v0  ;;  %v1932_v0 = vld [vmem:[#allocation2 + $0x2d4] ss:$8 sps:$4 sm:$0xff]  }
  0x81   :  { %703 = vmatprep.subr.bf16.mxu0 %v1866_v1  ;;  %v1930_v1 = vld [vmem:[#allocation2 + $0x2d0] ss:$8 sps:$4 sm:$0xff]  }
  0x84   :  { %704 = vmatpush1.bf16.msra.mxu0 %v1864_v4  ;;  %v1938_v4 = vld [vmem:[#allocation2 + $0x2f4] ss:$8 sps:$4 sm:$0xff]  }
  0x85   :  { %705 = vmatprep.subr.bf16.mxu0 %v1869_v5  ;;  %v1936_v5 = vld [vmem:[#allocation2 + $0x2f0] ss:$8 sps:$4 sm:$0xff]  }
  0x88   :  { %706 = vmatpush1.bf16.msra.mxu0 %v1867_v8  ;;  %v1981_v8 = vld [vmem:[#allocation4 + $0x2a4] ss:$24 sps:$4 sm:$0xff]  }
  0x89   :  { %707 = vmatprep.subr.bf16.mxu0 %v1872_v9  ;;  %v1983_v9 = vld [vmem:[#allocation4 + $0x2a0] ss:$24 sps:$4 sm:$0xff]   ;;  %1411 = vmatprep.subr.bf16.mxu1 %v1981_v8 }
  0x8a   :  { %1412 = vmatpush1.bf16.msra.mxu1 %v1983_v9  ;;  %v2050_v8 = vld [vmem:[#allocation4 + $0x100] ss:$24 sps:$4 sm:$0xff]   ;;  %v2055_v9 = vld [vmem:[#allocation4 + $0x134] ss:$24 sps:$4 sm:$0xff]  }
  0x8b   :  { %1413 = vmatprep.subr.bf16.mxu1 %v1984_v10  ;;  %v2053_v10 = vld [vmem:[#allocation4 + $0x130] ss:$24 sps:$4 sm:$0xff]  }
  0x8c   :  { %708 = vmatpush1.bf16.msra.mxu0 %v1870_v12  ;;  %v1989_v12 = vld [vmem:[#allocation4 + $0xc] ss:$24 sps:$4 sm:$0xff]  }
  0x8d   :  { %709 = vmatprep.subr.bf16.mxu0 %v1875_v13  ;;  %v158_v13 = vlaneseq }
  0x8e   :  { %1414 = vmatpush1.bf16.msra.mxu1 %v1986_v11  ;;  %v2058_v11 = vld [vmem:[#allocation4 + $0x164] ss:$24 sps:$4 sm:$0xff]  }
  0x8f   :  { %1424 = vmatprep.subr.bf16.mxu1 %v1989_v12  ;;  %v2233_v14 = vshrl.u32 %v158_v13, 7  ;;  %v2056_v12 = vld [vmem:[#allocation4 + $0x160] ss:$24 sps:$4 sm:$0xff]   ;;  %v2061_v13 = vld [vmem:[#allocation4 + $0x194] ss:$24 sps:$4 sm:$0xff]  }
  0x90   :  { %710 = vmatpush1.bf16.msra.mxu0 %v1873_v16  ;;  %v156_v16 = vld [vmem:[%s2276_s2] sm:$0x3] }
  0x91   :  { %711 = vmatprep.subr.bf16.mxu0 %v1878_v17  ;;  %v160_v15 = vsub.s32 0, %v2233_v14  ;;  %v164_v17 = vsub.s32 1, %v2233_v14 }
  0x93   :  { %v161_v18 = vrot.slane %v156_v16, %v160_v15  ;;  %v165_v19 = vrot.slane %v156_v16, %v164_v17  ;;  %v2059_v16 = vld [vmem:[#allocation4 + $0x190] ss:$24 sps:$4 sm:$0xff]  }
  0x94   :  { %712 = vmatpush1.bf16.msra.mxu0 %v1876_v20 }
  0x95   :  { %713 = vmatprep.subr.bf16.mxu0 %v1881_v21 }
  0x98   :  { %714 = vmatpush1.bf16.msra.mxu0 %v1879_v24 }
  0x99   :  { %715 = vmatprep.subr.bf16.mxu0 %v1884_v25 }
  0x9c   :  { %716 = vmatpush1.bf16.msra.mxu0 %v1882_v28 }
  0x9d   :  { %717 = vmatprep.subr.bf16.mxu0 %v1887_v29  ;;  %v1987_v29 = vld [vmem:[#allocation4 + $0x8] ss:$24 sps:$4 sm:$0xff]  }
  0xa0   :  { %718 = vmatpush1.bf16.msra.mxu0 %v1885_v31  ;;  %v1992_v31 = vld [vmem:[#allocation4 + $0x3c] ss:$24 sps:$4 sm:$0xff]  }
  0xa1   :  { %719 = vmatprep.subr.bf16.mxu0 %v1890_v32  ;;  %v1990_v32 = vld [vmem:[#allocation4 + $0x38] ss:$24 sps:$4 sm:$0xff]  }
  0xa4   :  { %720 = vmatpush1.bf16.msra.mxu0 %v1888_v33  ;;  %v1995_v33 = vld [vmem:[#allocation4 + $0x6c] ss:$24 sps:$4 sm:$0xff]  }
  0xa5   :  { %730 = vmatprep.subr.bf16.mxu0 %v1893_v35  ;;  %v1998_v35 = vld [vmem:[#allocation4 + $0x9c] ss:$24 sps:$4 sm:$0xff]  }
  0xa7   :  { %722 = vmatmul.mubr.bf16.vlgmr.msra.gmra.mrb[0].mxu0 %v56_v37  ;;  %v2001_v37 = vld [vmem:[#allocation4 + $0xcc] ss:$24 sps:$4 sm:$0xff]  }
  0xa8   :  { %731 = vmatpush1.bf16.msra.mxu0 %v1891_v38  ;;  %762 = vmatprep.mubr.bf16.mxu0 %v59_v39  ;;  %v1999_v38 = vld [vmem:[#allocation4 + $0xc8] ss:$24 sps:$4 sm:$0xff]   ;;  %v2004_v39 = vld [vmem:[#allocation4 + $0xfc] ss:$24 sps:$4 sm:$0xff]  }
  0xa9   :  { %732 = vmatprep.subr.bf16.mxu0 %v1896_v40  ;;  %v2002_v40 = vld [vmem:[#allocation4 + $0xf8] ss:$24 sps:$4 sm:$0xff]  }
  0xac   :  { %733 = vmatpush1.bf16.msra.mxu0 %v1894_v41  ;;  %v2007_v41 = vld [vmem:[#allocation4 + $0x12c] ss:$24 sps:$4 sm:$0xff]  }
  0xad   :  { %734 = vmatprep.subr.bf16.mxu0 %v1899_v42  ;;  %v2005_v42 = vld [vmem:[#allocation4 + $0x128] ss:$24 sps:$4 sm:$0xff]  }
  0xb0   :  { %735 = vmatpush1.bf16.msra.mxu0 %v1897_v43  ;;  %v2010_v43 = vld [vmem:[#allocation4 + $0x15c] ss:$24 sps:$4 sm:$0xff]  }
  0xb1   :  { %736 = vmatprep.subr.bf16.mxu0 %v1902_v44  ;;  %v2008_v44 = vld [vmem:[#allocation4 + $0x158] ss:$24 sps:$4 sm:$0xff]  }
  0xb4   :  { %737 = vmatpush1.bf16.msra.mxu0 %v1900_v45  ;;  %v2013_v45 = vld [vmem:[#allocation4 + $0x18c] ss:$24 sps:$4 sm:$0xff]  }
  0xb5   :  { %738 = vmatprep.subr.bf16.mxu0 %v1905_v46  ;;  %v2011_v46 = vld [vmem:[#allocation4 + $0x188] ss:$24 sps:$4 sm:$0xff]  }
  0xb8   :  { %739 = vmatpush1.bf16.msra.mxu0 %v1903_v47  ;;  %v2016_v47 = vld [vmem:[#allocation4 + $0x1bc] ss:$24 sps:$4 sm:$0xff]  }
  0xb9   :  { %740 = vmatprep.subr.bf16.mxu0 %v1908_v48  ;;  %v2014_v48 = vld [vmem:[#allocation4 + $0x1b8] ss:$24 sps:$4 sm:$0xff]  }
  0xbc   :  { %741 = vmatpush1.bf16.msra.mxu0 %v1906_v49  ;;  %v2019_v49 = vld [vmem:[#allocation4 + $0x1ec] ss:$24 sps:$4 sm:$0xff]  }
  0xbd   :  { %742 = vmatprep.subr.bf16.mxu0 %v1911_v50  ;;  %v2017_v50 = vld [vmem:[#allocation4 + $0x1e8] ss:$24 sps:$4 sm:$0xff]  }
  0xc0   :  { %743 = vmatpush1.bf16.msra.mxu0 %v1909_v51  ;;  %v2022_v51 = vld [vmem:[#allocation4 + $0x21c] ss:$24 sps:$4 sm:$0xff]  }
  0xc1   :  { %744 = vmatprep.subr.bf16.mxu0 %v1914_v52  ;;  %v2020_v52 = vld [vmem:[#allocation4 + $0x218] ss:$24 sps:$4 sm:$0xff]  }
  0xc4   :  { %745 = vmatpush1.bf16.msra.mxu0 %v1912_v53  ;;  %v2025_v53 = vld [vmem:[#allocation4 + $0x24c] ss:$24 sps:$4 sm:$0xff]  }
  0xc5   :  { %746 = vmatprep.subr.bf16.mxu0 %v1917_v54  ;;  %v2023_v54 = vld [vmem:[#allocation4 + $0x248] ss:$24 sps:$4 sm:$0xff]  }
  0xc8   :  { %747 = vmatpush1.bf16.msra.mxu0 %v1915_v55  ;;  %v2028_v55 = vld [vmem:[#allocation4 + $0x27c] ss:$24 sps:$4 sm:$0xff]  }
  0xc9   :  { %748 = vmatprep.subr.bf16.mxu0 %v1920_v56  ;;  %v2026_v56 = vld [vmem:[#allocation4 + $0x278] ss:$24 sps:$4 sm:$0xff]  }
  0xcc   :  { %749 = vmatpush1.bf16.msra.mxu0 %v1918_v57  ;;  %v2031_v57 = vld [vmem:[#allocation4 + $0x2ac] ss:$24 sps:$4 sm:$0xff]  }
  0xcd   :  { %750 = vmatprep.subr.bf16.mxu0 %v1923_v58  ;;  %v2029_v58 = vld [vmem:[#allocation4 + $0x2a8] ss:$24 sps:$4 sm:$0xff]  }
  0xd0   :  { %751 = vmatpush1.bf16.msra.mxu0 %v1921_v59  ;;  %v2034_v59 = vld [vmem:[#allocation4 + $0x2dc] ss:$24 sps:$4 sm:$0xff]  }
  0xd1   :  { %752 = vmatprep.subr.bf16.mxu0 %v1926_v60  ;;  %v2032_v60 = vld [vmem:[#allocation4 + $0x2d8] ss:$24 sps:$4 sm:$0xff]  }
  0xd4   :  { %753 = vmatpush1.bf16.msra.mxu0 %v1924_v61  ;;  %v2037_v61 = vld [vmem:[#allocation4 + $0x14] ss:$24 sps:$4 sm:$0xff]  }
  0xd5   :  { %754 = vmatprep.subr.bf16.mxu0 %v1929_v62  ;;  %v2035_v62 = vld [vmem:[#allocation4 + $0x10] ss:$24 sps:$4 sm:$0xff]  }
  0xd8   :  { %755 = vmatpush1.bf16.msra.mxu0 %v1927_v63  ;;  %v2040_v63 = vld [vmem:[#allocation4 + $0x44] ss:$24 sps:$4 sm:$0xff]  }
  0xd9   :  { %756 = vmatprep.subr.bf16.mxu0 %v1932_v0  ;;  %v2038_v0 = vld [vmem:[#allocation4 + $0x40] ss:$24 sps:$4 sm:$0xff]  }
  0xdc   :  { %757 = vmatpush1.bf16.msra.mxu0 %v1930_v1  ;;  %v2043_v1 = vld [vmem:[#allocation4 + $0x74] ss:$24 sps:$4 sm:$0xff]  }
  0xdd   :  { %758 = vmatprep.subr.bf16.mxu0 %v1935_v2  ;;  %v2041_v2 = vld [vmem:[#allocation4 + $0x70] ss:$24 sps:$4 sm:$0xff]  }
  0xe0   :  { %759 = vmatpush1.bf16.msra.mxu0 %v1933_v3  ;;  %v2046_v3 = vld [vmem:[#allocation4 + $0xa4] ss:$24 sps:$4 sm:$0xff]  }
  0xe1   :  { %760 = vmatprep.subr.bf16.mxu0 %v1938_v4  ;;  %v2044_v4 = vld [vmem:[#allocation4 + $0xa0] ss:$24 sps:$4 sm:$0xff]  }
  0xe4   :  { %761 = vmatpush1.bf16.msra.mxu0 %v1936_v5  ;;  %v2049_v5 = vld [vmem:[#allocation4 + $0xd4] ss:$24 sps:$4 sm:$0xff]  }
  0xe7   :  { %763 = vmatmul.mubr.bf16.vlgmr.msra.gmra.mrb[0].mxu0 %v58_v7  ;;  %v2052_v7 = vld [vmem:[#allocation4 + $0x104] ss:$24 sps:$4 sm:$0xff]  }
 0x1ba   :  { %v764_v20 = vpop.f32.mrb[0].mxu0 }
 0x1bb   :  { %v1779_v21 = vadd.f32 %v764_v20, %v161_v18  ;;  %v766_v22 = vpop.f32.mrb[1].mxu0  ;;  %v2064_v18 = vld [vmem:[#allocation4 + $0x1c4] ss:$24 sps:$4 sm:$0xff]   ;;  %v2067_v20 = vld [vmem:[#allocation4 + $0x1f4] ss:$24 sps:$4 sm:$0xff]  }
 0x1bc   :  { %v1780_v23 = vadd.f32 %v766_v22, %v165_v19  ;;  %v768_v24 = vpop.f32.mrb[2].mxu0  ;;  %v2062_v19 = vld [vmem:[#allocation4 + $0x1c0] ss:$24 sps:$4 sm:$0xff]   ;;  %v2070_v22 = vld [vmem:[#allocation4 + $0x224] ss:$24 sps:$4 sm:$0xff]  }
 0x1bd   :  { %v771_v25 = vmax.f32 %v1779_v21, 0.0  ;;  %v769_v26 = vpop.f32.mrb[3].mxu0  ;;  %v2065_v21 = vld [vmem:[#allocation4 + $0x1f0] ss:$24 sps:$4 sm:$0xff]   ;;  %v2073_v24 = vld [vmem:[#allocation4 + $0x254] ss:$24 sps:$4 sm:$0xff]  }
 0x1be   :  { %v772_v27 = vmax.f32 %v1780_v23, 0.0  ;;  %v2068_v23 = vld [vmem:[#allocation4 + $0x220] ss:$24 sps:$4 sm:$0xff]   ;;  %v2076_v26 = vld [vmem:[#allocation4 + $0x284] ss:$24 sps:$4 sm:$0xff]  }
 0x1bf   :  { %v2246_v30 = vpack.c.bf16 %v771_v25, %v771_v25  ;;  %v2071_v25 = vld [vmem:[#allocation4 + $0x250] ss:$24 sps:$4 sm:$0xff]  }
 0x1c0   :  { %v2244_v28 = vpack.c.bf16 %v772_v27, %v772_v27  ;;  %v2074_v27 = vld [vmem:[#allocation4 + $0x280] ss:$24 sps:$4 sm:$0xff]  }
 0x1c2   :  { %1415 = vmatprep.mubr.bf16.mxu1 %v2244_v28 }
 0x1c3   :  { %1416 = vmatmul.mubr.bf16.vlgmr.msra.gmra.mrb[0].mxu1 %v2246_v30 }
 0x1c4   :  { %1425 = vmatpush1.bf16.msra.mxu1 %v1987_v29  ;;  %1456 = vmatprep.mubr.bf16.mxu1 %v2244_v28  ;;  %v2077_v29 = vld [vmem:[#allocation4 + $0x2b0] ss:$24 sps:$4 sm:$0xff]  }
 0x1c5   :  { %1426 = vmatprep.subr.bf16.mxu1 %v1992_v31  ;;  %v2082_v31 = vld [vmem:[#allocation4 + $0x2e4] ss:$24 sps:$4 sm:$0xff]  }
 0x1c8   :  { %1427 = vmatpush1.bf16.msra.mxu1 %v1990_v32  ;;  %v2080_v32 = vld [vmem:[#allocation4 + $0x2e0] ss:$24 sps:$4 sm:$0xff]  }
 0x1c9   :  { %1428 = vmatprep.subr.bf16.mxu1 %v1995_v33  ;;  %v871_v33 = vld [vmem:[%s2278_s4] sm:$0x3f] }
 0x1cc   :  { %1429 = vmatpush1.bf16.msra.mxu1 %v1993_v34  ;;  %v876_v34 = vrot.slane %v871_v33, %v160_v15 }
 0x1cd   :  { %1430 = vmatprep.subr.bf16.mxu1 %v1998_v35  ;;  %v880_v35 = vrot.slane %v871_v33, %v164_v17  ;;  %v883_v17 = vsub.s32 2, %v2233_v14 }
 0x1d0   :  { %1431 = vmatpush1.bf16.msra.mxu1 %v1996_v36 }
 0x1d1   :  { %1432 = vmatprep.subr.bf16.mxu1 %v2001_v37 }
 0x1d4   :  { %1433 = vmatpush1.bf16.msra.mxu1 %v1999_v38 }
 0x1d5   :  { %1434 = vmatprep.subr.bf16.mxu1 %v2004_v39 }
 0x1d8   :  { %1435 = vmatpush1.bf16.msra.mxu1 %v2002_v40 }
 0x1d9   :  { %1436 = vmatprep.subr.bf16.mxu1 %v2007_v41 }
 0x1dc   :  { %1437 = vmatpush1.bf16.msra.mxu1 %v2005_v42 }
 0x1dd   :  { %1438 = vmatprep.subr.bf16.mxu1 %v2010_v43 }
 0x1e0   :  { %1439 = vmatpush1.bf16.msra.mxu1 %v2008_v44 }
 0x1e1   :  { %1440 = vmatprep.subr.bf16.mxu1 %v2013_v45 }
 0x1e4   :  { %1441 = vmatpush1.bf16.msra.mxu1 %v2011_v46 }
 0x1e5   :  { %1442 = vmatprep.subr.bf16.mxu1 %v2016_v47 }
 0x1e8   :  { %1443 = vmatpush1.bf16.msra.mxu1 %v2014_v48 }
 0x1e9   :  { %1444 = vmatprep.subr.bf16.mxu1 %v2019_v49  ;;  %v887_v49 = vsub.s32 3, %v2233_v14 }
 0x1ec   :  { %1445 = vmatpush1.bf16.msra.mxu1 %v2017_v50  ;;  %v884_v50 = vrot.slane %v871_v33, %v883_v17 }
 0x1ed   :  { %1446 = vmatprep.subr.bf16.mxu1 %v2022_v51  ;;  %v888_v51 = vrot.slane %v871_v33, %v887_v49 }
 0x1f0   :  { %1447 = vmatpush1.bf16.msra.mxu1 %v2020_v52 }
 0x1f1   :  { %1448 = vmatprep.subr.bf16.mxu1 %v2025_v53 }
 0x1f4   :  { %1449 = vmatpush1.bf16.msra.mxu1 %v2023_v54 }
 0x1f5   :  { %1450 = vmatprep.subr.bf16.mxu1 %v2028_v55 }
 0x1f8   :  { %1451 = vmatpush1.bf16.msra.mxu1 %v2026_v56 }
 0x1f9   :  { %1452 = vmatprep.subr.bf16.mxu1 %v2031_v57 }
 0x1fc   :  { %1453 = vmatpush1.bf16.msra.mxu1 %v2029_v58 }
 0x1fd   :  { %1454 = vmatprep.subr.bf16.mxu1 %v2034_v59 }
 0x200   :  { %1455 = vmatpush1.bf16.msra.mxu1 %v2032_v60 }
 0x201   :  { %1465 = vmatprep.subr.bf16.mxu1 %v2037_v61 }
 0x203   :  { %1457 = vmatmul.mubr.bf16.vlgmr.msra.gmra.mrb[4].mxu1 %v2246_v30 }
 0x204   :  { %1466 = vmatpush1.bf16.msra.mxu1 %v2035_v62  ;;  %1497 = vmatprep.mubr.bf16.mxu1 %v2244_v28  ;;  %v2079_v28 = vld [vmem:[#allocation4 + $0x2b4] ss:$24 sps:$4 sm:$0xff]  }
 0x205   :  { %1467 = vmatprep.subr.bf16.mxu1 %v2040_v63 }
 0x208   :  { %1468 = vmatpush1.bf16.msra.mxu1 %v2038_v0 }
 0x209   :  { %1469 = vmatprep.subr.bf16.mxu1 %v2043_v1 }
 0x20c   :  { %1470 = vmatpush1.bf16.msra.mxu1 %v2041_v2 }
 0x20d   :  { %1471 = vmatprep.subr.bf16.mxu1 %v2046_v3  ;;  %v891_v3 = vsub.s32 4, %v2233_v14 }
 0x210   :  { %1472 = vmatpush1.bf16.msra.mxu1 %v2044_v4  ;;  %v895_v4 = vsub.s32 5, %v2233_v14 }
 0x211   :  { %1473 = vmatprep.subr.bf16.mxu1 %v2049_v5  ;;  %v892_v5 = vrot.slane %v871_v33, %v891_v3 }
 0x214   :  { %1474 = vmatpush1.bf16.msra.mxu1 %v2047_v6  ;;  %v896_v6 = vrot.slane %v871_v33, %v895_v4 }
 0x215   :  { %1475 = vmatprep.subr.bf16.mxu1 %v2052_v7 }
 0x218   :  { %1476 = vmatpush1.bf16.msra.mxu1 %v2050_v8 }
 0x219   :  { %1477 = vmatprep.subr.bf16.mxu1 %v2055_v9 }
 0x21c   :  { %1478 = vmatpush1.bf16.msra.mxu1 %v2053_v10 }
 0x21d   :  { %1479 = vmatprep.subr.bf16.mxu1 %v2058_v11 }
 0x220   :  { %1480 = vmatpush1.bf16.msra.mxu1 %v2056_v12 }
 0x221   :  { %1481 = vmatprep.subr.bf16.mxu1 %v2061_v13 }
 0x224   :  { %1482 = vmatpush1.bf16.msra.mxu1 %v2059_v16 }
 0x225   :  { %1483 = vmatprep.subr.bf16.mxu1 %v2064_v18 }
 0x228   :  { %1484 = vmatpush1.bf16.msra.mxu1 %v2062_v19 }
 0x229   :  { %1485 = vmatprep.subr.bf16.mxu1 %v2067_v20 }
 0x22c   :  { %1486 = vmatpush1.bf16.msra.mxu1 %v2065_v21 }
 0x22d   :  { %1487 = vmatprep.subr.bf16.mxu1 %v2070_v22 }
 0x230   :  { %1488 = vmatpush1.bf16.msra.mxu1 %v2068_v23 }
 0x231   :  { %1489 = vmatprep.subr.bf16.mxu1 %v2073_v24 }
 0x234   :  { %1490 = vmatpush1.bf16.msra.mxu1 %v2071_v25 }
 0x235   :  { %1491 = vmatprep.subr.bf16.mxu1 %v2076_v26 }
 0x238   :  { %1492 = vmatpush1.bf16.msra.mxu1 %v2074_v27 }
 0x239   :  { %1493 = vmatprep.subr.bf16.mxu1 %v2079_v28 }
 0x23c   :  { %1494 = vmatpush1.bf16.msra.mxu1 %v2077_v29 }
 0x23d   :  { %1495 = vmatprep.subr.bf16.mxu1 %v2082_v31 }
 0x240   :  { %1496 = vmatpush1.bf16.msra.mxu1 %v2080_v32 }
 0x243   :  { %1498 = vmatmul.mubr.bf16.vlgmr.msra.gmra.mrb[8].mxu1 %v2246_v30 }
 0x296   :  { %v1417_v36 = vpop.f32.mrb[0].mxu1 }
 0x297   :  { %v1418_v37 = vadd.f32 %v1417_v36, %v876_v34  ;;  %v1419_v38 = vpop.f32.mrb[1].mxu1 }
 0x298   :  { %v1420_v39 = vadd.f32 %v1419_v38, %v880_v35  ;;  %v1421_v40 = vpop.f32.mrb[2].mxu1 }
 0x299   :  { %v1767_v41 = vmul.f32 -1.442695, %v1418_v37  ;;  %v1422_v42 = vpop.f32.mrb[3].mxu1 }
 0x29a   :  { %v1768_v43 = vmul.f32 -1.442695, %v1420_v39 }
 0x29b   :  { %2083 = vpow2.f32 %v1767_v41 }
 0x29c   :  { %2085 = vpow2.f32 %v1768_v43 }
 0x2a5   :  { %v2084_v30 = vpop.eup %2083 }
 0x2a6   :  { %v2086_v44 = vpop.eup %2085  ;;  %v1524_v45 = vadd.f32 1.0, %v2084_v30 }
 0x2a7   :  { %v1525_v46 = vadd.f32 1.0, %v2086_v44 }
 0x2a8   :  { %2087 = vrcp.f32 %v1524_v45 }
 0x2a9   :  { %2089 = vrcp.f32 %v1525_v46 }
 0x2b2   :  { %v2088_v15 = vpop.eup %2087 }
 0x2b3   :  { %v2090_v47 = vpop.eup %2089 }
 0x2b4   :  { %v1776_v48 = vpack.c.bf16 %v2090_v47, %v2088_v15 }
 0x2b6   :  { %1566 = vst [vmem:[%s2279_s5] sm:$0xff] %v1776_v48 }
 0x2d6   :  { %v1458_v52 = vpop.f32.mrb[4].mxu1 }
 0x2d7   :  { %v1459_v53 = vadd.f32 %v1458_v52, %v884_v50  ;;  %v1460_v54 = vpop.f32.mrb[5].mxu1 }
 0x2d8   :  { %v1461_v55 = vadd.f32 %v1460_v54, %v888_v51  ;;  %v1462_v56 = vpop.f32.mrb[6].mxu1 }
 0x2d9   :  { %v1769_v57 = vmul.f32 -1.442695, %v1459_v53  ;;  %v1463_v58 = vpop.f32.mrb[7].mxu1 }
 0x2da   :  { %v1770_v59 = vmul.f32 -1.442695, %v1461_v55 }
 0x2db   :  { %2091 = vpow2.f32 %v1769_v57 }
 0x2dc   :  { %2093 = vpow2.f32 %v1770_v59 }
 0x2e5   :  { %v2092_v60 = vpop.eup %2091 }
 0x2e6   :  { %v2094_v61 = vpop.eup %2093  ;;  %v1526_v62 = vadd.f32 1.0, %v2092_v60 }
 0x2e7   :  { %v1527_v63 = vadd.f32 1.0, %v2094_v61 }
 0x2e8   :  { %2095 = vrcp.f32 %v1526_v62 }
 0x2e9   :  { %2097 = vrcp.f32 %v1527_v63 }
 0x2f2   :  { %v2096_v0 = vpop.eup %2095 }
 0x2f3   :  { %v2098_v1 = vpop.eup %2097 }
 0x2f4   :  { %v1777_v2 = vpack.c.bf16 %v2098_v1, %v2096_v0 }
 0x2f6   :  { %1567 = vst [vmem:[%s2279_s5 + $0x8] sm:$0xff] %v1777_v2 }
 0x316   :  { %v1499_v7 = vpop.f32.mrb[8].mxu1 }
 0x317   :  { %v1500_v8 = vadd.f32 %v1499_v7, %v892_v5  ;;  %v1501_v9 = vpop.f32.mrb[9].mxu1 }
 0x318   :  { %v1502_v10 = vadd.f32 %v1501_v9, %v896_v6  ;;  %v1503_v11 = vpop.f32.mrb[10].mxu1 }
 0x319   :  { %v1771_v12 = vmul.f32 -1.442695, %v1500_v8  ;;  %v1504_v13 = vpop.f32.mrb[11].mxu1 }
 0x31a   :  { %v1772_v16 = vmul.f32 -1.442695, %v1502_v10 }
 0x31b   :  { %2099 = vpow2.f32 %v1771_v12 }
 0x31c   :  { %2101 = vpow2.f32 %v1772_v16 }
 0x325   :  { %v2100_v18 = vpop.eup %2099 }
 0x326   :  { %v2102_v19 = vpop.eup %2101  ;;  %v1528_v20 = vadd.f32 1.0, %v2100_v18 }
 0x327   :  { %v1529_v21 = vadd.f32 1.0, %v2102_v19 }
 0x328   :  { %2103 = vrcp.f32 %v1528_v20 }
 0x329   :  { %2105 = vrcp.f32 %v1529_v21 }
 0x332   :  { %v2104_v22 = vpop.eup %2103 }
 0x333   :  { %v2106_v14 = vpop.eup %2105 }
 0x334   :  { %v1778_v23 = vpack.c.bf16 %v2106_v14, %v2104_v22 }
 0x336   :  { %1568 = vst [vmem:[%s2279_s5 + $0x10] sm:$0xff] %v1778_v23 }
 0x337   :  { %1573 = vsyncpa [#allocation3], 1 }
 0x338   :  { %1574 = vsyncpa [#allocation5], 1 }

</bundles_post_ra>
